<compile_context>
chip_gen: v6e
topology: v6e:2x2x1
jax: 0.10.0
libtpu: 0.0.40
codegen_flags: <defaults>
</compile_context>

<pallas_src>
import jax
import jax.numpy as jnp
from jax.experimental import pallas as pl
from jax.experimental.pallas import tpu as pltpu


# ----------------------------------------------------------------------------
# block-size selection helpers
# ----------------------------------------------------------------------------

def _pick_divisor(n, target, multiple):
    """Largest divisor of n that is a multiple of `multiple` and <= target.

    Falls back to n itself (full dimension) if no such divisor exists, which
    keeps the (8, 128) BlockSpec constraint satisfied in all cases.
    """
    best = None
    hi = min(n, target)
    d = multiple
    while d <= hi:
        if n % d == 0:
            best = d
        d += multiple
    return best if best is not None else n


def _choose_blocks(rows, cols, max_bytes=2 * 1024 * 1024):
    """(block_rows, block_cols) for an f32 (rows, cols) slab, ~<=2 MiB/tile."""
    bc = _pick_divisor(cols, 2048, 128)          # lane-dense: multiple of 128
    max_rows = max(8, max_bytes // (bc * 4))
    br = _pick_divisor(rows, max_rows, 8)        # sublane: multiple of 8
    return br, bc


# ----------------------------------------------------------------------------
# Kernel 1: per-(batch, channel) mean over H*W
# ----------------------------------------------------------------------------

def pallas_channel_mean(x2):
    """x2: (N*C, H*W) -> (N*C, 1) mean over the spatial axis."""
    rows, hw = x2.shape
    br, bc = _choose_blocks(rows, hw)
    inv_hw = 1.0 / float(hw)

    def kernel(x_ref, o_ref):
        j = pl.program_id(1)

        @pl.when(j == 0)
        def _():
            o_ref[...] = jnp.zeros_like(o_ref)

        o_ref[...] += jnp.sum(x_ref[...], axis=-1, keepdims=True)

        @pl.when(j == pl.num_programs(1) - 1)
        def _():
            o_ref[...] = o_ref[...] * inv_hw

    return pl.pallas_call(
        kernel,
        out_shape=jax.ShapeDtypeStruct((rows, 1), jnp.float32),
        grid=(rows // br, hw // bc),
        in_specs=[pl.BlockSpec((br, bc), lambda i, j: (i, j))],
        out_specs=pl.BlockSpec((br, 1), lambda i, j: (i, 0)),
        compiler_params=pltpu.CompilerParams(
            dimension_semantics=("parallel", "arbitrary")),
    )(x2)


# ----------------------------------------------------------------------------
# Kernel 2: fused attention MLP  sigmoid(conv_b(PReLU(conv_a(mean))))
# ----------------------------------------------------------------------------

def pallas_cam_attention(means, wa, ba, wb, bb, prelu_a):
    """means: (N, C); wa: (C, hid); wb: (hid, C); prelu_a: (1,) -> (N, C)."""
    n, c = means.shape
    hid = wa.shape[1]
    ba2 = ba.reshape(1, hid)
    bb2 = bb.reshape(1, c)

    def kernel(m_ref, wa_ref, ba_ref, wb_ref, bb_ref, a_ref, o_ref):
        y = jnp.dot(m_ref[...], wa_ref[...],
                    preferred_element_type=jnp.float32) + ba_ref[...]
        slope = a_ref[0]                                  # learned PReLU slope
        y = jnp.where(y > 0, y, slope * y)
        y = jnp.dot(y, wb_ref[...],
                    preferred_element_type=jnp.float32) + bb_ref[...]
        o_ref[...] = jax.nn.sigmoid(y)

    return pl.pallas_call(
        kernel,
        out_shape=jax.ShapeDtypeStruct((n, c), jnp.float32),
        grid=(1,),
        in_specs=[pl.BlockSpec((n, c), lambda i: (0, 0)),
                  pl.BlockSpec((c, hid), lambda i: (0, 0)),
                  pl.BlockSpec((1, hid), lambda i: (0, 0)),
                  pl.BlockSpec((hid, c), lambda i: (0, 0)),
                  pl.BlockSpec((1, c), lambda i: (0, 0)),
                  # scalar PReLU slope lives on the scalar path (SMEM)
                  pl.BlockSpec(memory_space=pltpu.MemorySpace.SMEM)],
        out_specs=pl.BlockSpec((n, c), lambda i: (0, 0)),
    )(means, wa, ba2, wb, bb2, prelu_a)


# ----------------------------------------------------------------------------
# Kernel 3: broadcast multiply  out = x * scale (per batch-channel row)
# ----------------------------------------------------------------------------

def pallas_scale(x2, scale_col):
    """x2: (N*C, H*W), scale_col: (N*C, 1) -> (N*C, H*W)."""
    rows, hw = x2.shape
    br, bc = _choose_blocks(rows, hw)

    def kernel(x_ref, s_ref, o_ref):
        o_ref[...] = x_ref[...] * s_ref[...]

    return pl.pallas_call(
        kernel,
        out_shape=jax.ShapeDtypeStruct((rows, hw), jnp.float32),
        grid=(rows // br, hw // bc),
        in_specs=[pl.BlockSpec((br, bc), lambda i, j: (i, j)),
                  pl.BlockSpec((br, 1), lambda i, j: (i, 0))],
        out_specs=pl.BlockSpec((br, bc), lambda i, j: (i, j)),
        compiler_params=pltpu.CompilerParams(
            dimension_semantics=("parallel", "parallel")),
    )(x2, scale_col)


# ----------------------------------------------------------------------------
# Parameters (PyTorch shapes) and forward pass
# ----------------------------------------------------------------------------

def init_params(key, num_channels, compress_factor=8):
    hid = num_channels // compress_factor
    k = jax.random.split(key, 4)
    return {
        # nn.Conv2d(C, C//cf, 1): weight (hid, C, 1, 1), bias (hid,)
        "wa": 0.1 * jax.random.normal(k[0], (hid, num_channels, 1, 1),
                                      dtype=jnp.float32),
        "ba": 0.05 * jax.random.normal(k[1], (hid,), dtype=jnp.float32),
        # nn.Conv2d(C//cf, C, 1): weight (C, hid, 1, 1), bias (C,)
        "wb": 0.1 * jax.random.normal(k[2], (num_channels, hid, 1, 1),
                                      dtype=jnp.float32),
        "bb": 0.05 * jax.random.normal(k[3], (num_channels,),
                                       dtype=jnp.float32),
        # nn.PReLU(): single learned slope, default init 0.25
        "prelu_a": jnp.full((1,), 0.25, dtype=jnp.float32),
    }


def cam_forward(x, p):
    """x: (N, C, H, W) float32 -> (N, C, H, W)."""
    N, C, H, W = x.shape
    hid = p["wa"].shape[0]

    x2 = x.reshape(N * C, H * W)                       # zero-copy NCHW view

    means = pallas_channel_mean(x2)                    # (N*C, 1)
    means_nc = means.reshape(N, C)

    wa = p["wa"].reshape(hid, C).T                     # (C, hid)
    wb = p["wb"].reshape(C, hid).T                     # (hid, C)
    scale = pallas_cam_attention(means_nc, wa, p["ba"], wb, p["bb"],
                                 p["prelu_a"])         # (N, C)

    out2 = pallas_scale(x2, scale.reshape(N * C, 1))   # (N*C, H*W)
    return out2.reshape(N, C, H, W)


def cam_reference(x, p):
    """Pure-JAX reference for correctness checking."""
    N, C, H, W = x.shape
    hid = p["wa"].shape[0]
    y = jnp.mean(x, axis=(2, 3))                                  # (N, C)
    y = y @ p["wa"].reshape(hid, C).T + p["ba"]
    y = jnp.where(y > 0, y, p["prelu_a"][0] * y)
    y = y @ p["wb"].reshape(C, hid).T + p["bb"]
    y = jax.nn.sigmoid(y)
    return x * y[:, :, None, None]


# ----------------------------------------------------------------------------

if __name__ == "__main__":
    N, C, H, W = 2, 32, 16, 16          # C divisible by compress_factor=8
    compress_factor = 8

    key = jax.random.PRNGKey(0)
    kx, kp = jax.random.split(key)
    x = jax.random.normal(kx, (N, C, H, W), dtype=jnp.float32)
    params = init_params(kp, C, compress_factor)

    fwd = jax.jit(lambda xx: cam_forward(xx, params))
    y = fwd(x)
    jax.block_until_ready(y)

    assert y.shape == (N, C, H, W), y.shape
    assert bool(jnp.all(jnp.isfinite(y)))

    y_ref = cam_reference(x, params)
    assert bool(jnp.allclose(y, y_ref, atol=1e-4, rtol=1e-4)), (
        float(jnp.max(jnp.abs(y - y_ref))))

    print("KERNEL_OK")
</pallas_src>

<mosaic_0001>
module attributes {stable_mosaic.version = 11 : i64} {
  func.func @kernel(%arg0: i32, %arg1: i32, %arg2: memref<64x256xf32, #tpu.memory_space<vmem>>, %arg3: memref<64x1xf32, #tpu.memory_space<vmem>>) attributes {dimension_semantics = [#tpu.dimension_semantics<parallel>, #tpu.dimension_semantics<arbitrary>], iteration_bounds = array<i64: 1, 1>, scalar_prefetch = 0 : i64, scratch_operands = 0 : i64, tpu.core_type = #tpu.core_type<tc>, window_params = [{transform_indices = @transform_0, window_bounds = array<i64: 64, 256>}, {transform_indices = @transform_1, window_bounds = array<i64: 64, 1>}]} {
    %c0_i32 = arith.constant 0 : i32
    %0 = arith.cmpi eq, %arg1, %c0_i32 : i32
    %1 = arith.extui %0 : i1 to i32
    %c0_i32_0 = arith.constant 0 : i32
    %2 = arith.cmpi ne, %1, %c0_i32_0 : i32
    scf.if %2 {
      %cst_8 = arith.constant 0.000000e+00 : f32
      %12 = vector.broadcast %cst_8 : f32 to vector<64x1xf32>
      %c0_9 = arith.constant 0 : index
      %c0_10 = arith.constant 0 : index
      %13 = vector.load %arg3[%c0_9, %c0_10] : memref<64x1xf32, #tpu.memory_space<vmem>>, vector<64x1xf32>
      tpu.vector_store %arg3[%c0_9, %c0_10], %12 {strides = array<i32>} : memref<64x1xf32, #tpu.memory_space<vmem>>, vector<64x1xf32>,
    } else {
    }
    %c0 = arith.constant 0 : index
    %c0_1 = arith.constant 0 : index
    %3 = vector.load %arg3[%c0, %c0_1] : memref<64x1xf32, #tpu.memory_space<vmem>>, vector<64x1xf32>
    %c0_2 = arith.constant 0 : index
    %c0_3 = arith.constant 0 : index
    %4 = vector.load %arg2[%c0_2, %c0_3] : memref<64x256xf32, #tpu.memory_space<vmem>>, vector<64x256xf32>
    %cst = arith.constant dense<0.000000e+00> : vector<64xf32>
    %5 = vector.multi_reduction <add>, %4, %cst [1] : vector<64x256xf32> to vector<64xf32>
    %6 = vector.shape_cast %5 : vector<64xf32> to vector<64x1xf32>
    %7 = arith.addf %3, %6 : vector<64x1xf32>
    %c0_4 = arith.constant 0 : index
    %c0_5 = arith.constant 0 : index
    %8 = vector.load %arg3[%c0_4, %c0_5] : memref<64x1xf32, #tpu.memory_space<vmem>>, vector<64x1xf32>
    tpu.vector_store %arg3[%c0_4, %c0_5], %7 {strides = array<i32>} : memref<64x1xf32, #tpu.memory_space<vmem>>, vector<64x1xf32>,
    %c0_i32_6 = arith.constant 0 : i32
    %9 = arith.cmpi eq, %arg1, %c0_i32_6 : i32
    %10 = arith.extui %9 : i1 to i32
    %c0_i32_7 = arith.constant 0 : i32
    %11 = arith.cmpi ne, %10, %c0_i32_7 : i32
    scf.if %11 {
      %c0_8 = arith.constant 0 : index
      %c0_9 = arith.constant 0 : index
      %12 = vector.load %arg3[%c0_8, %c0_9] : memref<64x1xf32, #tpu.memory_space<vmem>>, vector<64x1xf32>
      %cst_10 = arith.constant 3.906250e-03 : f32
      %13 = vector.broadcast %cst_10 : f32 to vector<64x1xf32>
      %14 = arith.mulf %12, %13 : vector<64x1xf32>
      %c0_11 = arith.constant 0 : index
      %c0_12 = arith.constant 0 : index
      %15 = vector.load %arg3[%c0_11, %c0_12] : memref<64x1xf32, #tpu.memory_space<vmem>>, vector<64x1xf32>
      tpu.vector_store %arg3[%c0_11, %c0_12], %14 {strides = array<i32>} : memref<64x1xf32, #tpu.memory_space<vmem>>, vector<64x1xf32>,
    } else {
    }
    return
  }
  func.func @transform_0(%arg0: i32, %arg1: i32) -> (i32, i32) {
    %c0_i32 = arith.constant 0 : i32
    return %arg0, %arg1 : i32, i32
  }
  func.func @transform_1(%arg0: i32, %arg1: i32) -> (i32, i32) {
    %c0_i32 = arith.constant 0 : i32
    %c0_i32_0 = arith.constant 0 : i32
    return %arg0, %c0_i32 : i32, i32
  }
}

module attributes {stable_mosaic.version = 11 : i64} {
  func.func @kernel(%arg0: i32, %arg1: memref<2x32xf32, #tpu.memory_space<vmem>>, %arg2: memref<32x4xf32, #tpu.memory_space<vmem>>, %arg3: memref<1x4xf32, #tpu.memory_space<vmem>>, %arg4: memref<4x32xf32, #tpu.memory_space<vmem>>, %arg5: memref<1x32xf32, #tpu.memory_space<vmem>>, %arg6: memref<1xf32, #tpu.memory_space<smem>>, %arg7: memref<2x32xf32, #tpu.memory_space<vmem>>) attributes {dimension_semantics = [#tpu.dimension_semantics<arbitrary>], iteration_bounds = array<i64: 1>, scalar_prefetch = 0 : i64, scratch_operands = 0 : i64, tpu.core_type = #tpu.core_type<tc>, window_params = [{pipeline_mode = #tpu.pipeline_mode<synchronous>, transform_indices = @transform_0, window_bounds = array<i64: 2, 32>}, {pipeline_mode = #tpu.pipeline_mode<synchronous>, transform_indices = @transform_1, window_bounds = array<i64: 32, 4>}, {pipeline_mode = #tpu.pipeline_mode<synchronous>, transform_indices = @transform_2, window_bounds = array<i64: 1, 4>}, {pipeline_mode = #tpu.pipeline_mode<synchronous>, transform_indices = @transform_3, window_bounds = array<i64: 4, 32>}, {pipeline_mode = #tpu.pipeline_mode<synchronous>, transform_indices = @transform_4, window_bounds = array<i64: 1, 32>}, {transform_indices = @transform_5, window_bounds = array<i64: 1>}, {pipeline_mode = #tpu.pipeline_mode<synchronous>, transform_indices = @transform_6, window_bounds = array<i64: 2, 32>}]} {
    %c0 = arith.constant 0 : index
    %c0_0 = arith.constant 0 : index
    %0 = vector.load %arg1[%c0, %c0_0] : memref<2x32xf32, #tpu.memory_space<vmem>>, vector<2x32xf32>
    %c0_1 = arith.constant 0 : index
    %c0_2 = arith.constant 0 : index
    %1 = vector.load %arg2[%c0_1, %c0_2] : memref<32x4xf32, #tpu.memory_space<vmem>>, vector<32x4xf32>
    %cst = arith.constant dense<0.000000e+00> : vector<2x4xf32>
    %2 = tpu.matmul %0, %1, %cst {dimension_numbers = #tpu.dot_dimension_numbers<[1], [0], [0], [1], [0, 0, 1, 1], [], []>} : vector<2x32xf32>, vector<32x4xf32>, vector<2x4xf32> -> vector<2x4xf32>
    %c0_3 = arith.constant 0 : index
    %c0_4 = arith.constant 0 : index
    %3 = vector.load %arg3[%c0_3, %c0_4] : memref<1x4xf32, #tpu.memory_space<vmem>>, vector<1x4xf32>
    %4 = vector.broadcast %3 : vector<1x4xf32> to vector<2x4xf32>
    %5 = arith.addf %2, %4 : vector<2x4xf32>
    %c0_5 = arith.constant 0 : index
    %6 = memref.load %arg6[%c0_5] : memref<1xf32, #tpu.memory_space<smem>>
    %cst_6 = arith.constant 0.000000e+00 : f32
    %7 = vector.broadcast %cst_6 : f32 to vector<2x4xf32>
    %8 = arith.cmpf ogt, %5, %7 : vector<2x4xf32>
    %9 = vector.broadcast %6 : f32 to vector<2x4xf32>
    %10 = arith.mulf %9, %5 : vector<2x4xf32>
    %11 = arith.select %8, %5, %10 : vector<2x4xi1>, vector<2x4xf32>
    %c0_7 = arith.constant 0 : index
    %c0_8 = arith.constant 0 : index
    %12 = vector.load %arg4[%c0_7, %c0_8] : memref<4x32xf32, #tpu.memory_space<vmem>>, vector<4x32xf32>
    %cst_9 = arith.constant dense<0.000000e+00> : vector<2x32xf32>
    %13 = tpu.matmul %11, %12, %cst_9 {dimension_numbers = #tpu.dot_dimension_numbers<[1], [0], [0], [1], [0, 0, 1, 1], [], []>} : vector<2x4xf32>, vector<4x32xf32>, vector<2x32xf32> -> vector<2x32xf32>
    %c0_10 = arith.constant 0 : index
    %c0_11 = arith.constant 0 : index
    %14 = vector.load %arg5[%c0_10, %c0_11] : memref<1x32xf32, #tpu.memory_space<vmem>>, vector<1x32xf32>
    %15 = vector.broadcast %14 : vector<1x32xf32> to vector<2x32xf32>
    %16 = arith.addf %13, %15 : vector<2x32xf32>
    %17 = arith.negf %16 : vector<2x32xf32>
    %18 = math.exp %17 : vector<2x32xf32>
    %cst_12 = arith.constant 1.000000e+00 : f32
    %19 = vector.broadcast %cst_12 : f32 to vector<2x32xf32>
    %20 = arith.addf %19, %18 : vector<2x32xf32>
    %21 = arith.divf %19, %20 : vector<2x32xf32>
    %c0_13 = arith.constant 0 : index
    %c0_14 = arith.constant 0 : index
    %22 = vector.load %arg7[%c0_13, %c0_14] : memref<2x32xf32, #tpu.memory_space<vmem>>, vector<2x32xf32>
    tpu.vector_store %arg7[%c0_13, %c0_14], %21 {strides = array<i32>} : memref<2x32xf32, #tpu.memory_space<vmem>>, vector<2x32xf32>,
    return
  }
  func.func @transform_0(%arg0: i32) -> (i32, i32) {
    %c0_i32 = arith.constant 0 : i32
    %c0_i32_0 = arith.constant 0 : i32
    %c0_i32_1 = arith.constant 0 : i32
    return %c0_i32, %c0_i32_0 : i32, i32
  }
  func.func @transform_1(%arg0: i32) -> (i32, i32) {
    %c0_i32 = arith.constant 0 : i32
    %c0_i32_0 = arith.constant 0 : i32
    %c0_i32_1 = arith.constant 0 : i32
    return %c0_i32, %c0_i32_0 : i32, i32
  }
  func.func @transform_2(%arg0: i32) -> (i32, i32) {
    %c0_i32 = arith.constant 0 : i32
    %c0_i32_0 = arith.constant 0 : i32
    %c0_i32_1 = arith.constant 0 : i32
    return %c0_i32, %c0_i32_0 : i32, i32
  }
  func.func @transform_3(%arg0: i32) -> (i32, i32) {
    %c0_i32 = arith.constant 0 : i32
    %c0_i32_0 = arith.constant 0 : i32
    %c0_i32_1 = arith.constant 0 : i32
    return %c0_i32, %c0_i32_0 : i32, i32
  }
  func.func @transform_4(%arg0: i32) -> (i32, i32) {
    %c0_i32 = arith.constant 0 : i32
    %c0_i32_0 = arith.constant 0 : i32
    %c0_i32_1 = arith.constant 0 : i32
    return %c0_i32, %c0_i32_0 : i32, i32
  }
  func.func @transform_5(%arg0: i32) -> i32 {
    %c0_i32 = arith.constant 0 : i32
    %c0_i32_0 = arith.constant 0 : i32
    return %c0_i32 : i32
  }
  func.func @transform_6(%arg0: i32) -> (i32, i32) {
    %c0_i32 = arith.constant 0 : i32
    %c0_i32_0 = arith.constant 0 : i32
    %c0_i32_1 = arith.constant 0 : i32
    return %c0_i32, %c0_i32_0 : i32, i32
  }
}

module attributes {stable_mosaic.version = 11 : i64} {
  func.func @kernel(%arg0: i32, %arg1: i32, %arg2: memref<64x256xf32, #tpu.memory_space<vmem>>, %arg3: memref<64x1xf32, #tpu.memory_space<vmem>>, %arg4: memref<64x256xf32, #tpu.memory_space<vmem>>) attributes {dimension_semantics = [#tpu.dimension_semantics<parallel>, #tpu.dimension_semantics<parallel>], iteration_bounds = array<i64: 1, 1>, scalar_prefetch = 0 : i64, scratch_operands = 0 : i64, tpu.core_type = #tpu.core_type<tc>, window_params = [{transform_indices = @transform_0, window_bounds = array<i64: 64, 256>}, {transform_indices = @transform_1, window_bounds = array<i64: 64, 1>}, {transform_indices = @transform_2, window_bounds = array<i64: 64, 256>}]} {
    %c0 = arith.constant 0 : index
    %c0_0 = arith.constant 0 : index
    %0 = vector.load %arg2[%c0, %c0_0] : memref<64x256xf32, #tpu.memory_space<vmem>>, vector<64x256xf32>
    %c0_1 = arith.constant 0 : index
    %c0_2 = arith.constant 0 : index
    %1 = vector.load %arg3[%c0_1, %c0_2] : memref<64x1xf32, #tpu.memory_space<vmem>>, vector<64x1xf32>
    %2 = vector.broadcast %1 : vector<64x1xf32> to vector<64x256xf32>
    %3 = arith.mulf %0, %2 : vector<64x256xf32>
    %c0_3 = arith.constant 0 : index
    %c0_4 = arith.constant 0 : index
    %4 = vector.load %arg4[%c0_3, %c0_4] : memref<64x256xf32, #tpu.memory_space<vmem>>, vector<64x256xf32>
    tpu.vector_store %arg4[%c0_3, %c0_4], %3 {strides = array<i32>} : memref<64x256xf32, #tpu.memory_space<vmem>>, vector<64x256xf32>,
    return
  }
  func.func @transform_0(%arg0: i32, %arg1: i32) -> (i32, i32) {
    %c0_i32 = arith.constant 0 : i32
    return %arg0, %arg1 : i32, i32
  }
  func.func @transform_1(%arg0: i32, %arg1: i32) -> (i32, i32) {
    %c0_i32 = arith.constant 0 : i32
    %c0_i32_0 = arith.constant 0 : i32
    return %arg0, %c0_i32 : i32, i32
  }
  func.func @transform_2(%arg0: i32, %arg1: i32) -> (i32, i32) {
    %c0_i32 = arith.constant 0 : i32
    return %arg0, %arg1 : i32, i32
  }
}

</mosaic_0001>

<bundles_post_ra>
// kernel: _lambda_.3
= control target key start
LH: loop header
LB: loop body
LE: loop exit
PB: predicated region body
PF: predicated region fallthrough
CT: control target
= control target key end

     0   :  { %vm12_vm0 = vcmask 7168   ;;  %v118_v3 = vmov 0.0   ;;  %s321_s0 = inlined_call_operand.vmem [shape: f32[64,256], index: 0, kind: input, shape index: {}]   ;;  %s322_s1 = inlined_call_operand.vmem [shape: f32[64,1], index: 1, kind: output, shape index: {}]  }
   0x1   :  { %v33_v0 = vld [vmem:[%s321_s0 + $0x20] sm:$0xff]  ;;  %v34_v1 = vld [vmem:[%s321_s0 + $0x28] sm:$0xff]  ;;  %15 = vst.msk [vmem:[%s322_s1 + $0x10] sm:$0xff] %vm12_vm0, %v118_v3  ;;  %13 = vst.msk [vmem:[%s322_s1] sm:$0xff] %vm12_vm0, %v118_v3 }
   0x2   :  { %v29_v2 = vld [vmem:[%s321_s0] sm:$0xff]  ;;  %14 = vst.msk [vmem:[%s322_s1 + $0x8] sm:$0xff] %vm12_vm0, %v118_v3  ;;  %16 = vst.msk [vmem:[%s322_s1 + $0x18] sm:$0xff] %vm12_vm0, %v118_v3  ;;  %v51_v4 = vadd.f32 %v34_v1, %v33_v0  ;;  %v30_v5 = vld [vmem:[%s321_s0 + $0x8] sm:$0xff] }
   0x3   :  { %17 = vst.msk [vmem:[%s322_s1 + $0x20] sm:$0xff] %vm12_vm0, %v118_v3  ;;  %18 = vst.msk [vmem:[%s322_s1 + $0x28] sm:$0xff] %vm12_vm0, %v118_v3  ;;  %v35_v6 = vld [vmem:[%s321_s0 + $0x30] sm:$0xff]  ;;  %v36_v7 = vld [vmem:[%s321_s0 + $0x38] sm:$0xff]  ;;  %v45_v8 = vadd.f32 %v30_v5, %v29_v2 }
   0x4   :  { %19 = vst.msk [vmem:[%s322_s1 + $0x30] sm:$0xff] %vm12_vm0, %v118_v3  ;;  %20 = vst.msk [vmem:[%s322_s1 + $0x38] sm:$0xff] %vm12_vm0, %v118_v3  ;;  %v31_v9 = vld [vmem:[%s321_s0 + $0x10] sm:$0xff]  ;;  %v32_v10 = vld [vmem:[%s321_s0 + $0x18] sm:$0xff]  ;;  %52 = vadd.xlane.f32.xlu1 %v51_v4  ;;  %v54_v11 = vadd.f32 %v36_v7, %v35_v6 }
   0x5   :  { %46 = vadd.xlane.f32.xlu0 %v45_v8  ;;  %v48_v12 = vadd.f32 %v32_v10, %v31_v9  ;;  %v39_v13 = vld [vmem:[%s321_s0 + $0x50] sm:$0xff]  ;;  %v40_v14 = vld [vmem:[%s321_s0 + $0x58] sm:$0xff]  ;;  %v37_v15 = vld [vmem:[%s321_s0 + $0x40] sm:$0xff] }
   0x6   :  { %v38_v16 = vld [vmem:[%s321_s0 + $0x48] sm:$0xff]  ;;  %v60_v17 = vadd.f32 %v40_v14, %v39_v13  ;;  %v43_v19 = vld [vmem:[%s321_s0 + $0x70] sm:$0xff]  ;;  %v44_v20 = vld [vmem:[%s321_s0 + $0x78] sm:$0xff] }
   0x7   :  { %v57_v18 = vadd.f32 %v38_v16, %v37_v15  ;;  %v41_v21 = vld [vmem:[%s321_s0 + $0x60] sm:$0xff]  ;;  %v42_v22 = vld [vmem:[%s321_s0 + $0x68] sm:$0xff]  ;;  %v66_v23 = vadd.f32 %v44_v20, %v43_v19 }
   0x8   :  { %55 = vadd.xlane.f32.xlu1 %v54_v11  ;;  %v63_v24 = vadd.f32 %v42_v22, %v41_v21  ;;  %v23_v25 = vld [vmem:[%s322_s1 + $0x10] sm:$0xff]  ;;  %v21_v26 = vld [vmem:[%s322_s1] sm:$0xff] }
   0x9   :  { %49 = vadd.xlane.f32.xlu0 %v48_v12  ;;  %v24_v31 = vld [vmem:[%s322_s1 + $0x18] sm:$0xff]  ;;  %v22_v32 = vld [vmem:[%s322_s1 + $0x8] sm:$0xff] }
   0xa   :  { %v26_v37 = vld [vmem:[%s322_s1 + $0x28] sm:$0xff]  ;;  %v25_v38 = vld [vmem:[%s322_s1 + $0x20] sm:$0xff] }
   0xb   :  { %v28_v44 = vld [vmem:[%s322_s1 + $0x38] sm:$0xff]  ;;  %v27_v47 = vld [vmem:[%s322_s1 + $0x30] sm:$0xff] }
   0xc   :  { %61 = vadd.xlane.f32.xlu1 %v60_v17 }
   0xd   :  { %58 = vadd.xlane.f32.xlu0 %v57_v18 }
  0x10   :  { %67 = vadd.xlane.f32.xlu1 %v66_v23 }
  0x11   :  { %64 = vadd.xlane.f32.xlu0 %v63_v24 }
  0x8d   :  { %v53_v27 = vpop.xlane.xlu1 %52 }
  0x8e   :  { %v71_v28 = vadd.f32 %v53_v27, %v23_v25  ;;  %v47_v29 = vpop.xlane.xlu0 %46 }
  0x8f   :  { %v69_v30 = vadd.f32 %v47_v29, %v21_v26 }
  0x90   :  { %80 = vst.msk [vmem:[%s322_s1 + $0x10] sm:$0xff] %vm12_vm0, %v71_v28 }
  0x91   :  { %78 = vst.msk [vmem:[%s322_s1] sm:$0xff] %vm12_vm0, %v69_v30  ;;  %v56_v33 = vpop.xlane.xlu1 %55 }
  0x92   :  { %v72_v34 = vadd.f32 %v56_v33, %v24_v31  ;;  %v50_v35 = vpop.xlane.xlu0 %49 }
  0x93   :  { %v70_v36 = vadd.f32 %v50_v35, %v22_v32 }
  0x94   :  { %81 = vst.msk [vmem:[%s322_s1 + $0x18] sm:$0xff] %vm12_vm0, %v72_v34 }
  0x95   :  { %79 = vst.msk [vmem:[%s322_s1 + $0x8] sm:$0xff] %vm12_vm0, %v70_v36  ;;  %v62_v39 = vpop.xlane.xlu1 %61 }
  0x96   :  { %v74_v40 = vadd.f32 %v62_v39, %v26_v37  ;;  %v59_v41 = vpop.xlane.xlu0 %58 }
  0x97   :  { %v91_v42 = vld [vmem:[%s322_s1 + $0x10] sm:$0xff]  ;;  %v73_v43 = vadd.f32 %v59_v41, %v25_v38 }
  0x98   :  { %v99_v45 = vmul.f32 0.00390625, %v91_v42  ;;  %v89_v46 = vld [vmem:[%s322_s1] sm:$0xff]  ;;  %83 = vst.msk [vmem:[%s322_s1 + $0x28] sm:$0xff] %vm12_vm0, %v74_v40 }
  0x99   :  { %v97_v48 = vmul.f32 0.00390625, %v89_v46  ;;  %82 = vst.msk [vmem:[%s322_s1 + $0x20] sm:$0xff] %vm12_vm0, %v73_v43  ;;  %v68_v49 = vpop.xlane.xlu1 %67 }
  0x9a   :  { %107 = vst.msk [vmem:[%s322_s1 + $0x10] sm:$0xff] %vm12_vm0, %v99_v45  ;;  %v76_v50 = vadd.f32 %v68_v49, %v28_v44  ;;  %v65_v51 = vpop.xlane.xlu0 %64 }
  0x9b   :  { %105 = vst.msk [vmem:[%s322_s1] sm:$0xff] %vm12_vm0, %v97_v48  ;;  %v92_v52 = vld [vmem:[%s322_s1 + $0x18] sm:$0xff]  ;;  %v75_v53 = vadd.f32 %v65_v51, %v27_v47 }
  0x9c   :  { %v100_v54 = vmul.f32 0.00390625, %v92_v52  ;;  %v90_v55 = vld [vmem:[%s322_s1 + $0x8] sm:$0xff]  ;;  %85 = vst.msk [vmem:[%s322_s1 + $0x38] sm:$0xff] %vm12_vm0, %v76_v50 }
  0x9d   :  { %v98_v56 = vmul.f32 0.00390625, %v90_v55  ;;  %84 = vst.msk [vmem:[%s322_s1 + $0x30] sm:$0xff] %vm12_vm0, %v75_v53 }
  0x9e   :  { %108 = vst.msk [vmem:[%s322_s1 + $0x18] sm:$0xff] %vm12_vm0, %v100_v54 }
  0x9f   :  { %106 = vst.msk [vmem:[%s322_s1 + $0x8] sm:$0xff] %vm12_vm0, %v98_v56  ;;  %v94_v57 = vld [vmem:[%s322_s1 + $0x28] sm:$0xff] }
  0xa0   :  { %v102_v58 = vmul.f32 0.00390625, %v94_v57  ;;  %v93_v59 = vld [vmem:[%s322_s1 + $0x20] sm:$0xff] }
  0xa1   :  { %v101_v60 = vmul.f32 0.00390625, %v93_v59 }
  0xa2   :  { %110 = vst.msk [vmem:[%s322_s1 + $0x28] sm:$0xff] %vm12_vm0, %v102_v58 }
  0xa3   :  { %109 = vst.msk [vmem:[%s322_s1 + $0x20] sm:$0xff] %vm12_vm0, %v101_v60  ;;  %v96_v61 = vld [vmem:[%s322_s1 + $0x38] sm:$0xff] }
  0xa4   :  { %v104_v62 = vmul.f32 0.00390625, %v96_v61  ;;  %v95_v63 = vld [vmem:[%s322_s1 + $0x30] sm:$0xff] }
  0xa5   :  { %v103_v0 = vmul.f32 0.00390625, %v95_v63 }
  0xa6   :  { %112 = vst.msk [vmem:[%s322_s1 + $0x38] sm:$0xff] %vm12_vm0, %v104_v62 }
  0xa7   :  { %111 = vst.msk [vmem:[%s322_s1 + $0x30] sm:$0xff] %vm12_vm0, %v103_v0 }

// kernel: _lambda_.4
= control target key start
LH: loop header
LB: loop body
LE: loop exit
PB: predicated region body
PF: predicated region fallthrough
CT: control target
= control target key end

     0   :  { %v248_v0 = vmov 0.0   ;;  %vm249_vm0 = vmmov 0   ;;  %vm36_vm1 = vcmask 261120   ;;  %vm127_vm2 = vcmask 1043456   ;;  %s315_s1 = inlined_call_operand.vmem [shape: f32[32,4], index: 1, kind: input, shape index: {}]   ;;  %s316_s0 = inlined_call_operand.vmem [shape: f32[2,32], index: 0, kind: input, shape index: {}]   ;;  %s317_s3 = inlined_call_operand.vmem [shape: f32[4,32], index: 3, kind: input, shape index: {}]   ;;  %s318_s2 = inlined_call_operand.vmem [shape: f32[1,4], index: 2, kind: input, shape index: {}]   ;;  %s319_s5 = inlined_call_operand.<no memory space> [shape: f32[1], index: 5, kind: input, shape index: {}]   ;;  %s320_s4 = inlined_call_operand.vmem [shape: f32[1,32], index: 4, kind: input, shape index: {}]   ;;  %s321_s6 = inlined_call_operand.vmem [shape: f32[2,32], index: 6, kind: output, shape index: {}]  }
   0x1   :  { %226 = vmatprep.subr.mxu0 %v248_v0  ;;  %v28_v1 = vld [vmem:[%s315_s1 + $0x18] sm:$0xff]  ;;  %v27_v2 = vld [vmem:[%s315_s1 + $0x10] sm:$0xff]  ;;  %234 = vmatprep.mubr.msk.f32.mxu0 %vm249_vm0, %v248_v0  ;;  %v26_v3 = vld [vmem:[%s315_s1 + $0x8] sm:$0xff]  ;;  %v112_v9 = vstv %s319_s5  ;;  %vm123_vm4 = vcmask 31744   ;;  %vm207_vm5 = vcmask 254976  }
   0x2   :  { %227 = vmatpush3.msra.mxu0 %v28_v1  ;;  %237 = vmatprep.subr.mxu1 %v248_v0  ;;  %v25_v4 = vld [vmem:[%s315_s1] sm:$0xff] }
   0x3   :  { %228 = vmatprep.subr.mxu0 %v248_v0  ;;  %239 = vmatprep.mubr.msk.f32.mxu1 %vm249_vm0, %v248_v0  ;;  %v24_v5 = vld [vmem:[%s316_s0] sm:$0x3] }
   0x4   :  { %229 = vmatpush3.msra.mxu0 %v27_v2  ;;  %v115_v6 = vld [vmem:[%s317_s3] sm:$0xf] }
   0x5   :  { %230 = vmatprep.subr.mxu0 %v248_v0  ;;  %238 = vmatpush3.msk.msra.mxu1 %vm127_vm2, %v115_v6  ;;  %v213_v7 = vld [vmem:[%s318_s2] ss:$0 sm:$0xff] }
   0x6   :  { %231 = vmatpush3.msra.mxu0 %v26_v3  ;;  %v215_v14 = vld [vmem:[%s320_s4] ss:$0 sm:$0xff] }
   0x7   :  { %232 = vmatprep.subr.mxu0 %v248_v0 }
   0x8   :  { %233 = vmatpush3.msra.mxu0 %v25_v4 }
   0x9   :  { %235 = vmatmul.mubr.msk.f32.vlgmr.msra.gmra.mxu0 %vm36_vm1, %v24_v5 }
  0xc9   :  { %v106_v8 = vpop.f32.mrf.mxu0 }
  0xca   :  { %v107_v10 = vadd.f32 %v213_v7, %v106_v8 }
  0xcb   :  { %v236_v11 = vpop.f32.mrf.mxu0 }
  0xcc   :  { %vm111_vm3 = vcmp.gt.f32.partialorder %v107_v10, 0.0  ;;  %v113_v12 = vmul.f32 %v112_v9, %v107_v10 }
  0xce   :  { %v114_v13 = vsel %vm111_vm3, %v107_v10, %v113_v12 }
  0xcf   :  { %240 = vmatmul.mubr.msk.f32.vlgmr.msra.gmra.mxu1 %vm123_vm4, %v114_v13 }
 0x18f   :  { %v197_v15 = vpop.f32.mrf.mxu1 }
 0x190   :  { %v198_v16 = vadd.f32 %v215_v14, %v197_v15 }
 0x191   :  { %v241_v17 = vpop.f32.mrf.mxu1 }
 0x192   :  { %v218_v18 = vmul.f32 -1.442695, %v198_v16 }
 0x194   :  { %244 = vpow2.f32 %v218_v18 }
 0x1a1   :  { %v245_v19 = vpop.eup %244 }
 0x1a2   :  { %v204_v20 = vadd.f32 1.0, %v245_v19 }
 0x1a4   :  { %246 = vrcp.f32 %v204_v20 }
 0x1b1   :  { %v247_v21 = vpop.eup %246 }
 0x1b2   :  { %208 = vst.msk [vmem:[%s321_s6] sm:$0x3] %vm207_vm5, %v247_v21 }

// kernel: _lambda_.5
= control target key start
LH: loop header
LB: loop body
LE: loop exit
PB: predicated region body
PF: predicated region fallthrough
CT: control target
= control target key end

     0   :  { %v114_v0 = vmov 0   ;;  %s250_s1 = inlined_call_operand.vmem [shape: f32[64,1], index: 1, kind: input, shape index: {}]   ;;  %s251_s0 = inlined_call_operand.vmem [shape: f32[64,256], index: 0, kind: input, shape index: {}]   ;;  %s252_s2 = inlined_call_operand.vmem [shape: f32[64,256], index: 2, kind: output, shape index: {}]  }
   0x1   :  { %113 = vset.pattern.permute.xlu1 %v114_v0  ;;  %112 = vset.pattern.permute.xlu0 %v114_v0  ;;  %v29_v1 = vld [vmem:[%s250_s1 + $0x10] sm:$0xff]  ;;  %v27_v2 = vld [vmem:[%s250_s1] sm:$0xff]  ;;  %v30_v3 = vld [vmem:[%s250_s1 + $0x18] sm:$0xff] }
   0x2   :  { %47 = vperm.xlu1 %113, %v29_v1   ;;  %37 = vperm.xlu0 %112, %v27_v2   ;;  %v28_v4 = vld [vmem:[%s250_s1 + $0x8] sm:$0xff]  ;;  %v31_v6 = vld [vmem:[%s250_s1 + $0x20] sm:$0xff]  ;;  %v34_v7 = vld [vmem:[%s250_s1 + $0x38] sm:$0xff] }
   0x3   :  { %v32_v5 = vld [vmem:[%s250_s1 + $0x28] sm:$0xff]  ;;  %v33_v8 = vld [vmem:[%s250_s1 + $0x30] sm:$0xff]  ;;  %v15_v9 = vld [vmem:[%s251_s0 + $0x20] sm:$0xff] }
   0x4   :  { %v16_v10 = vld [vmem:[%s251_s0 + $0x28] sm:$0xff]  ;;  %v11_v11 = vld [vmem:[%s251_s0] sm:$0xff]  ;;  %v17_v19 = vld [vmem:[%s251_s0 + $0x30] sm:$0xff] }
   0x5   :  { %v12_v12 = vld [vmem:[%s251_s0 + $0x8] sm:$0xff]  ;;  %v18_v20 = vld [vmem:[%s251_s0 + $0x38] sm:$0xff]  ;;  %v13_v21 = vld [vmem:[%s251_s0 + $0x10] sm:$0xff] }
   0x6   :  { %52 = vperm.xlu1 %113, %v30_v3   ;;  %42 = vperm.xlu0 %112, %v28_v4   ;;  %v14_v22 = vld [vmem:[%s251_s0 + $0x18] sm:$0xff]  ;;  %v21_v29 = vld [vmem:[%s251_s0 + $0x50] sm:$0xff]  ;;  %v19_v31 = vld [vmem:[%s251_s0 + $0x40] sm:$0xff] }
   0x7   :  { %v22_v30 = vld [vmem:[%s251_s0 + $0x58] sm:$0xff]  ;;  %v20_v32 = vld [vmem:[%s251_s0 + $0x48] sm:$0xff]  ;;  %v25_v39 = vld [vmem:[%s251_s0 + $0x70] sm:$0xff] }
   0x8   :  { %v26_v40 = vld [vmem:[%s251_s0 + $0x78] sm:$0xff]  ;;  %v23_v41 = vld [vmem:[%s251_s0 + $0x60] sm:$0xff]  ;;  %v24_v42 = vld [vmem:[%s251_s0 + $0x68] sm:$0xff] }
   0xa   :  { %62 = vperm.xlu1 %113, %v32_v5   ;;  %57 = vperm.xlu0 %112, %v31_v6  }
   0xe   :  { %72 = vperm.xlu1 %113, %v34_v7   ;;  %67 = vperm.xlu0 %112, %v33_v8  }
  0x7d   :  { %v48_v13 = vpop.permute.xlu1 %47  ;;  %v38_v14 = vpop.permute.xlu0 %37 }
  0x7e   :  { %v79_v15 = vmul.f32 %v48_v13, %v15_v9  ;;  %v80_v16 = vmul.f32 %v48_v13, %v16_v10  ;;  %v75_v17 = vmul.f32 %v38_v14, %v11_v11  ;;  %v76_v18 = vmul.f32 %v38_v14, %v12_v12 }
  0x80   :  { %95 = vst [vmem:[%s252_s2 + $0x20] sm:$0xff] %v79_v15  ;;  %96 = vst [vmem:[%s252_s2 + $0x28] sm:$0xff] %v80_v16 }
  0x81   :  { %91 = vst [vmem:[%s252_s2] sm:$0xff] %v75_v17  ;;  %92 = vst [vmem:[%s252_s2 + $0x8] sm:$0xff] %v76_v18  ;;  %v53_v23 = vpop.permute.xlu1 %52  ;;  %v43_v24 = vpop.permute.xlu0 %42 }
  0x82   :  { %v81_v25 = vmul.f32 %v53_v23, %v17_v19  ;;  %v82_v26 = vmul.f32 %v53_v23, %v18_v20  ;;  %v77_v27 = vmul.f32 %v43_v24, %v13_v21  ;;  %v78_v28 = vmul.f32 %v43_v24, %v14_v22 }
  0x84   :  { %97 = vst [vmem:[%s252_s2 + $0x30] sm:$0xff] %v81_v25  ;;  %98 = vst [vmem:[%s252_s2 + $0x38] sm:$0xff] %v82_v26 }
  0x85   :  { %93 = vst [vmem:[%s252_s2 + $0x10] sm:$0xff] %v77_v27  ;;  %94 = vst [vmem:[%s252_s2 + $0x18] sm:$0xff] %v78_v28  ;;  %v63_v33 = vpop.permute.xlu1 %62  ;;  %v58_v34 = vpop.permute.xlu0 %57 }
  0x86   :  { %v85_v35 = vmul.f32 %v63_v33, %v21_v29  ;;  %v86_v36 = vmul.f32 %v63_v33, %v22_v30  ;;  %v83_v37 = vmul.f32 %v58_v34, %v19_v31  ;;  %v84_v38 = vmul.f32 %v58_v34, %v20_v32 }
  0x88   :  { %101 = vst [vmem:[%s252_s2 + $0x50] sm:$0xff] %v85_v35  ;;  %102 = vst [vmem:[%s252_s2 + $0x58] sm:$0xff] %v86_v36 }
  0x89   :  { %99 = vst [vmem:[%s252_s2 + $0x40] sm:$0xff] %v83_v37  ;;  %100 = vst [vmem:[%s252_s2 + $0x48] sm:$0xff] %v84_v38  ;;  %v73_v43 = vpop.permute.xlu1 %72  ;;  %v68_v44 = vpop.permute.xlu0 %67 }
  0x8a   :  { %v89_v45 = vmul.f32 %v73_v43, %v25_v39  ;;  %v90_v46 = vmul.f32 %v73_v43, %v26_v40  ;;  %v87_v47 = vmul.f32 %v68_v44, %v23_v41  ;;  %v88_v48 = vmul.f32 %v68_v44, %v24_v42 }
  0x8c   :  { %105 = vst [vmem:[%s252_s2 + $0x70] sm:$0xff] %v89_v45  ;;  %106 = vst [vmem:[%s252_s2 + $0x78] sm:$0xff] %v90_v46 }
  0x8d   :  { %103 = vst [vmem:[%s252_s2 + $0x60] sm:$0xff] %v87_v47  ;;  %104 = vst [vmem:[%s252_s2 + $0x68] sm:$0xff] %v88_v48 }

</bundles_post_ra>
